<compile_context>
chip_gen: v6e
topology: v6e:2x2x1
jax: 0.10.0
libtpu: 0.0.40
codegen_flags: <defaults>
</compile_context>

<pallas_src>
import numpy as np
import jax
import jax.numpy as jnp
from jax.experimental import pallas as pl
from jax.experimental.pallas import tpu as pltpu


def _roundup(x: int, m: int) -> int:
    return ((x + m - 1) // m) * m


def _resize_weight_matrix(in_size: int, out_size: int, antialias: bool = True) -> np.ndarray:
    """(out_size, in_size) bilinear resize matrix.

    Matches torchvision semantics: PIL-style antialiased triangle filter when
    downsampling, plain bilinear (align_corners=False) otherwise.  Rows are
    normalized to sum to 1 (this also reproduces edge clamping behavior).
    """
    if in_size == out_size:
        return np.eye(out_size, dtype=np.float32)
    scale = in_size / out_size
    filterscale = scale if (antialias and scale > 1.0) else 1.0
    centers = (np.arange(out_size, dtype=np.float64) + 0.5) * scale
    src = np.arange(in_size, dtype=np.float64)
    x = (src[None, :] + 0.5 - centers[:, None]) / filterscale
    w = np.clip(1.0 - np.abs(x), 0.0, None)
    w = w / w.sum(axis=1, keepdims=True)
    return w.astype(np.float32)


def _band_layout(wh_pad: np.ndarray, t_hout: int, n_h: int, H: int, H_pad8: int):
    """Banded Wh: per h-tile input-row offset table + cropped weight tiles.

    Returns (whb[n_h, t_hout, band_h], row_start[n_h] (multiples of 8), band_h
    (multiple of 8, <= H_pad8)); rows [row_start[t], row_start[t]+band_h)
    always cover every nonzero column of that tile's Wh rows.
    """
    lo_list, hi_list = [], []
    for t in range(n_h):
        rows = wh_pad[t * t_hout:(t + 1) * t_hout]
        nz = np.nonzero(np.abs(rows).sum(axis=0) > 0)[0]
        if nz.size == 0:            # tile of pure zero-padding rows (defensive)
            lo, hi = 0, 1
        else:
            lo, hi = int(nz[0]), int(nz[-1]) + 1
        lo_list.append(lo)
        hi_list.append(hi)
    starts0 = [(lo // 8) * 8 for lo in lo_list]
    band_needed = max(hi - s for hi, s in zip(hi_list, starts0))
    band_h = min(_roundup(band_needed, 8), H_pad8)

    row_start = np.zeros((n_h,), np.int32)
    whb = np.zeros((n_h, t_hout, band_h), np.float32)
    for t in range(n_h):
        s = min(starts0[t], H_pad8 - band_h)      # multiple of 8, stays in-bounds
        row_start[t] = s
        e = min(s + band_h, H)                    # never read past real wh columns
        whb[t, :, :e - s] = wh_pad[t * t_hout:(t + 1) * t_hout, s:e]
    return whb, row_start, band_h


def _make_seg_kernel(h_first: bool, H: int, H_pad8: int, W: int, band_h: int):
    def kernel(row_start_ref, scale_ref, bias_ref,   # scalar-prefetch (SMEM)
               x_ref, whb_ref, wwt_ref,              # inputs
               o_ref,                                # output
               xbf_ref):                             # VMEM scratch: cached bf16 plane
        h = pl.program_id(2)
        c = pl.program_id(1)

        # Convert the (H, W) plane to bf16 once per (b, c) and cache it.
        @pl.when(h == 0)
        def _():
            xb16 = x_ref[...].astype(jnp.bfloat16)   # single cast pass
            if H_pad8 == H:
                xbf_ref[...] = xb16
            else:
                xbf_ref[:H, :] = xb16
                xbf_ref[H:, :] = jnp.zeros((H_pad8 - H, W), jnp.bfloat16)

        if h_first:
            # Banded first matmul: only the contributing input rows.
            r0 = pl.multiple_of(row_start_ref[h], 8)
            xband = xbf_ref[pl.ds(r0, band_h), :]                       # (band_h, W)
            tmp = jnp.dot(whb_ref[...], xband,
                          preferred_element_type=jnp.float32)           # (t_hout, W)
            y = jnp.dot(tmp.astype(jnp.bfloat16), wwt_ref[...],
                        preferred_element_type=jnp.float32)             # (t_hout, Wout_pad)
        else:
            tmp = jnp.dot(xbf_ref[...], wwt_ref[...],
                          preferred_element_type=jnp.float32)           # (H_pad8, Wout_pad)
            y = jnp.dot(whb_ref[...], tmp.astype(jnp.bfloat16),
                        preferred_element_type=jnp.float32)             # (Hout, Wout_pad)

        # convert_image_dtype + normalize folded into one per-channel FMA.
        o_ref[...] = (y * scale_ref[c] + bias_ref[c]).astype(o_ref.dtype)

    return kernel


def semantic_segmentation_preprocess(img,
                                     *,
                                     resize_size,
                                     mean=(0.485, 0.456, 0.406),
                                     std=(0.229, 0.224, 0.225),
                                     antialias=True,
                                     max_tile_rows=256):
    """Equivalent of SemanticSegmentation.forward for tensor inputs."""
    squeeze_batch = False
    if img.ndim == 3:                      # (C, H, W) -> (1, C, H, W)
        img = img[None]
        squeeze_batch = True
    B, C, H, W = img.shape

    # torchvision resize with size=[s]: smaller edge -> s, keep aspect ratio.
    if resize_size is not None:
        short, long_ = (H, W) if H <= W else (W, H)
        new_short = int(resize_size)
        new_long = int(resize_size * long_ / short)
        Hout, Wout = (new_short, new_long) if H <= W else (new_long, new_short)
    else:
        Hout, Wout = H, W

    wh_np = _resize_weight_matrix(H, Hout, antialias)       # (Hout, H)
    ww_np = _resize_weight_matrix(W, Wout, antialias)       # (Wout, W)

    # Lane-dense output: pad Wout to a multiple of 128 (zero wwt columns,
    # padding sliced off below).
    Wout_pad = _roundup(max(Wout, 1), 128)
    wwt_np = np.zeros((W, Wout_pad), np.float32)
    wwt_np[:, :Wout] = ww_np.T

    # Output-row tiling: even, multiple-of-8 tiles; zero-pad Wh rows if needed
    # (no OOB reads on the weight matrix).
    if Hout > max_tile_rows:
        n_h = -(-Hout // max_tile_rows)
        t_hout = _roundup(-(-Hout // n_h), 8)
        Hout_pad = n_h * t_hout
    else:
        n_h, t_hout, Hout_pad = 1, Hout, Hout
    wh_pad = np.zeros((Hout_pad, H), np.float32)
    wh_pad[:Hout] = wh_np

    H_pad8 = _roundup(H, 8)

    # Matmul order: Wh-first is required when tiling output rows.
    if n_h > 1:
        h_first = True
    else:
        h_first = Hout * W * (H + Wout_pad) <= H * Wout_pad * (W + Hout)

    if h_first:
        whb_np, row_start_np, band_h = _band_layout(wh_pad, t_hout, n_h, H, H_pad8)
    else:
        band_h = H_pad8
        row_start_np = np.zeros((n_h,), np.int32)
        whb_np = np.zeros((n_h, t_hout, band_h), np.float32)
        whb_np[0, :, :H] = wh_pad

    whb = jnp.asarray(whb_np, dtype=jnp.bfloat16)            # (n_h, t_hout, band_h)
    wwt = jnp.asarray(wwt_np, dtype=jnp.bfloat16)            # (W, Wout_pad)
    row_start = jnp.asarray(row_start_np, dtype=jnp.int32)   # (n_h,)

    # convert_image_dtype + normalize folded into one per-channel FMA.
    mean_np = np.asarray(mean, np.float32)
    std_np = np.asarray(std, np.float32)
    if jnp.issubdtype(img.dtype, jnp.integer):
        max_val = float(jnp.iinfo(img.dtype).max)
    else:
        max_val = 1.0
    scale = jnp.asarray(1.0 / (max_val * std_np), dtype=jnp.float32)
    bias = jnp.asarray(-mean_np / std_np, dtype=jnp.float32)

    grid_spec = pltpu.PrefetchScalarGridSpec(
        num_scalar_prefetch=3,
        grid=(B, C, n_h),
        in_specs=[
            pl.BlockSpec((pl.Squeezed(), pl.Squeezed(), H, W),
                         lambda b, c, h, rs, sc, bs: (b, c, 0, 0)),
            pl.BlockSpec((pl.Squeezed(), t_hout, band_h),
                         lambda b, c, h, rs, sc, bs: (h, 0, 0)),
            pl.BlockSpec((W, Wout_pad),
                         lambda b, c, h, rs, sc, bs: (0, 0)),
        ],
        out_specs=pl.BlockSpec((pl.Squeezed(), pl.Squeezed(), t_hout, Wout_pad),
                               lambda b, c, h, rs, sc, bs: (b, c, h, 0)),
        scratch_shapes=[pltpu.VMEM((H_pad8, W), jnp.bfloat16)],
    )

    # VMEM budget: estimate the working set and clamp to the real device VMEM.
    in_bytes = img.dtype.itemsize
    vmem_est = (2 * H * W * in_bytes              # x plane, double-buffered
                + H_pad8 * W * 2                  # cached bf16 plane (scratch)
                + 2 * t_hout * band_h * 2         # banded Wh tiles (bf16)
                + 2 * W * Wout_pad * 2            # Ww^T (bf16)
                + 2 * t_hout * Wout_pad * 4       # output tiles (f32)
                + 2 * t_hout * max(W, Wout_pad) * 4)  # matmul intermediates
    try:
        cap = int(getattr(pltpu.get_tpu_info(), "vmem_capacity_bytes",
                          64 * 1024 * 1024))
    except Exception:
        cap = 64 * 1024 * 1024
    vmem_limit = int(min(max(int(vmem_est * 1.5), 32 * 1024 * 1024),
                         int(cap * 0.9)))

    if h_first:
        mm_flops = n_h * t_hout * band_h * W + Hout_pad * W * Wout_pad
    else:
        mm_flops = H_pad8 * W * Wout_pad + Hout_pad * H_pad8 * Wout_pad
    flops = int(2 * B * C * mm_flops)
    bytes_accessed = int(B * C * (H * W * in_bytes + Hout_pad * Wout_pad * 4
                                  + n_h * t_hout * band_h * 2 + W * Wout_pad * 2))

    out = pl.pallas_call(
        _make_seg_kernel(h_first, H, H_pad8, W, band_h),
        out_shape=jax.ShapeDtypeStruct((B, C, Hout_pad, Wout_pad), jnp.float32),
        grid_spec=grid_spec,
        compiler_params=pltpu.CompilerParams(
            # h must be sequential (scratch cache carried across h); keeping it
            # "arbitrary" also makes the megacore shard over (b, c).
            dimension_semantics=("parallel", "parallel", "arbitrary"),
            vmem_limit_bytes=vmem_limit),
        cost_estimate=pl.CostEstimate(flops=flops, transcendentals=0,
                                      bytes_accessed=bytes_accessed),
    )(row_start, scale, bias, img, whb, wwt)

    if Hout_pad != Hout or Wout_pad != Wout:
        out = out[..., :Hout, :Wout]
    if squeeze_batch:
        out = out[0]
    return out


def _reference(img, wh_f32, ww_f32, mean, std):
    # Pure-JAX f32 reference of the same math for a sanity check.
    x = img.astype(jnp.float32)
    if jnp.issubdtype(img.dtype, jnp.integer):
        x = x / float(jnp.iinfo(img.dtype).max)
    y = jnp.einsum("oh,bchw->bcow", wh_f32, x)
    y = jnp.einsum("bcow,pw->bcop", y, ww_f32)
    m = jnp.asarray(mean, jnp.float32)[None, :, None, None]
    s = jnp.asarray(std, jnp.float32)[None, :, None, None]
    return (y - m) / s


if __name__ == "__main__":
    key = jax.random.PRNGKey(0)
    mean = (0.485, 0.456, 0.406)
    std = (0.229, 0.224, 0.225)
    k1, k2, k3, k4 = jax.random.split(key, 4)

    def run_and_check(x, resize_size, out_hw, **kw):
        out = jax.block_until_ready(
            semantic_segmentation_preprocess(x, resize_size=resize_size,
                                             mean=mean, std=std, **kw))
        Hout, Wout = out_hw
        H, W = x.shape[-2], x.shape[-1]
        wh = jnp.asarray(_resize_weight_matrix(H, Hout, True))
        ww = jnp.asarray(_resize_weight_matrix(W, Wout, True))
        ref = _reference(x, wh, ww, mean, std)
        assert out.shape == ref.shape, (out.shape, ref.shape)
        err = float(jnp.max(jnp.abs(out - ref)))
        assert jnp.allclose(out, ref, atol=5e-2, rtol=5e-2), err
        return out

    # Test 1: uint8 input (common torchvision path), (2,3,16,16) -> 8x8.
    x1 = jax.random.randint(k1, (2, 3, 16, 16), 0, 256,
                            dtype=jnp.int32).astype(jnp.uint8)
    run_and_check(x1, 8, (8, 8))

    # Test 2: float32 input, non-square downsample.
    x2 = jax.random.uniform(k2, (1, 3, 32, 16), dtype=jnp.float32)
    run_and_check(x2, 8, (16, 8))

    # Test 3: forces row tiling (n_h > 1): exercises the banded-Wh path, the
    # Hout/Wout zero-padding, and the padded-slab slicing.
    x3 = jax.random.randint(k3, (1, 3, 72, 36), 0, 256,
                            dtype=jnp.int32).astype(jnp.uint8)
    run_and_check(x3, 18, (36, 18), max_tile_rows=8)

    # Test 4: wide upsample that selects the Ww-first matmul order.
    x4 = jax.random.uniform(k4, (1, 3, 8, 256), dtype=jnp.float32)
    run_and_check(x4, 16, (16, 512))

    print("KERNEL_OK")
</pallas_src>

<mosaic_0001>
module attributes {stable_mosaic.version = 11 : i64} {
  func.func @kernel(%arg0: i32, %arg1: i32, %arg2: i32, %arg3: memref<1xi32, #tpu.memory_space<smem>>, %arg4: memref<3xf32, #tpu.memory_space<smem>>, %arg5: memref<3xf32, #tpu.memory_space<smem>>, %arg6: memref<1x1x16x16xi8, #tpu.memory_space<vmem>>, %arg7: memref<1x8x16xbf16, #tpu.memory_space<vmem>>, %arg8: memref<16x128xbf16, #tpu.memory_space<vmem>>, %arg9: memref<1x1x8x128xf32, #tpu.memory_space<vmem>>, %arg10: memref<16x16xbf16, #tpu.memory_space<vmem>>) attributes {dimension_semantics = [#tpu.dimension_semantics<parallel>, #tpu.dimension_semantics<parallel>, #tpu.dimension_semantics<arbitrary>], iteration_bounds = array<i64: 2, 3, 1>, scalar_prefetch = 3 : i64, scratch_operands = 1 : i64, tpu.core_type = #tpu.core_type<tc>, window_params = [{transform_indices = @transform_0, window_bounds = array<i64: 1, 1, 16, 16>}, {transform_indices = @transform_1, window_bounds = array<i64: 1, 8, 16>}, {pipeline_mode = #tpu.pipeline_mode<synchronous>, transform_indices = @transform_2, window_bounds = array<i64: 16, 128>}, {transform_indices = @transform_3, window_bounds = array<i64: 1, 1, 8, 128>}]} {
    %c0_i32 = arith.constant 0 : i32
    %0 = arith.cmpi eq, %arg2, %c0_i32 : i32
    %1 = arith.extui %0 : i1 to i32
    %c0_i32_0 = arith.constant 0 : i32
    %2 = arith.cmpi ne, %1, %c0_i32_0 : i32
    scf.if %2 {
      %c0_11 = arith.constant 0 : index
      %c0_12 = arith.constant 0 : index
      %c0_13 = arith.constant 0 : index
      %c0_14 = arith.constant 0 : index
      %25 = vector.load %arg6[%c0_11, %c0_12, %c0_13, %c0_14] : memref<1x1x16x16xi8, #tpu.memory_space<vmem>>, vector<1x1x16x16xi8>
      %26 = vector.shape_cast %25 : vector<1x1x16x16xi8> to vector<16x16xi8>
      %27 = arith.uitofp %26 : vector<16x16xi8> to vector<16x16xbf16>
      %c0_15 = arith.constant 0 : index
      %c0_16 = arith.constant 0 : index
      %28 = vector.load %arg10[%c0_15, %c0_16] : memref<16x16xbf16, #tpu.memory_space<vmem>>, vector<16x16xbf16>
      tpu.vector_store %arg10[%c0_15, %c0_16], %27 {strides = array<i32>} : memref<16x16xbf16, #tpu.memory_space<vmem>>, vector<16x16xbf16>,
    } else {
    }
    %3 = arith.index_cast %arg2 : i32 to index
    %4 = memref.load %arg3[%3] : memref<1xi32, #tpu.memory_space<smem>>
    %5 = tpu.assume_multiple %4, 8 : i32
    %6 = arith.index_cast %5 : i32 to index
    %c0 = arith.constant 0 : index
    %7 = vector.load %arg10[%6, %c0] : memref<16x16xbf16, #tpu.memory_space<vmem>>, vector<16x16xbf16>
    %c0_1 = arith.constant 0 : index
    %c0_2 = arith.constant 0 : index
    %c0_3 = arith.constant 0 : index
    %8 = vector.load %arg7[%c0_1, %c0_2, %c0_3] : memref<1x8x16xbf16, #tpu.memory_space<vmem>>, vector<1x8x16xbf16>
    %9 = vector.shape_cast %8 : vector<1x8x16xbf16> to vector<8x16xbf16>
    %cst = arith.constant dense<0.000000e+00> : vector<8x16xf32>
    %10 = tpu.matmul %9, %7, %cst {dimension_numbers = #tpu.dot_dimension_numbers<[1], [0], [0], [1], [0, 0, 1, 1], [], []>} : vector<8x16xbf16>, vector<16x16xbf16>, vector<8x16xf32> -> vector<8x16xf32>
    %11 = arith.truncf %10 : vector<8x16xf32> to vector<8x16xbf16>
    %c0_4 = arith.constant 0 : index
    %c0_5 = arith.constant 0 : index
    %12 = vector.load %arg8[%c0_4, %c0_5] : memref<16x128xbf16, #tpu.memory_space<vmem>>, vector<16x128xbf16>
    %cst_6 = arith.constant dense<0.000000e+00> : vector<8x128xf32>
    %13 = tpu.matmul %11, %12, %cst_6 {dimension_numbers = #tpu.dot_dimension_numbers<[1], [0], [0], [1], [0, 0, 1, 1], [], []>} : vector<8x16xbf16>, vector<16x128xbf16>, vector<8x128xf32> -> vector<8x128xf32>
    %14 = arith.index_cast %arg1 : i32 to index
    %15 = memref.load %arg4[%14] : memref<3xf32, #tpu.memory_space<smem>>
    %16 = vector.broadcast %15 : f32 to vector<8x128xf32>
    %17 = arith.mulf %13, %16 : vector<8x128xf32>
    %18 = arith.index_cast %arg1 : i32 to index
    %19 = memref.load %arg5[%18] : memref<3xf32, #tpu.memory_space<smem>>
    %20 = vector.broadcast %19 : f32 to vector<8x128xf32>
    %21 = arith.addf %17, %20 : vector<8x128xf32>
    %c0_7 = arith.constant 0 : index
    %c0_8 = arith.constant 0 : index
    %c0_9 = arith.constant 0 : index
    %c0_10 = arith.constant 0 : index
    %22 = vector.load %arg9[%c0_7, %c0_8, %c0_9, %c0_10] : memref<1x1x8x128xf32, #tpu.memory_space<vmem>>, vector<1x1x8x128xf32>
    %23 = vector.shape_cast %22 : vector<1x1x8x128xf32> to vector<8x128xf32>
    %24 = vector.shape_cast %21 : vector<8x128xf32> to vector<1x1x8x128xf32>
    tpu.vector_store %arg9[%c0_7, %c0_8, %c0_9, %c0_10], %24 {strides = array<i32>} : memref<1x1x8x128xf32, #tpu.memory_space<vmem>>, vector<1x1x8x128xf32>,
    return
  }
  func.func @transform_0(%arg0: i32, %arg1: i32, %arg2: i32, %arg3: memref<1xi32, #tpu.memory_space<smem>>, %arg4: memref<3xf32, #tpu.memory_space<smem>>, %arg5: memref<3xf32, #tpu.memory_space<smem>>) -> (i32, i32, i32, i32) {
    %c0_i32 = arith.constant 0 : i32
    %c0_i32_0 = arith.constant 0 : i32
    %c0_i32_1 = arith.constant 0 : i32
    return %arg0, %arg1, %c0_i32, %c0_i32_0 : i32, i32, i32, i32
  }
  func.func @transform_1(%arg0: i32, %arg1: i32, %arg2: i32, %arg3: memref<1xi32, #tpu.memory_space<smem>>, %arg4: memref<3xf32, #tpu.memory_space<smem>>, %arg5: memref<3xf32, #tpu.memory_space<smem>>) -> (i32, i32, i32) {
    %c0_i32 = arith.constant 0 : i32
    %c0_i32_0 = arith.constant 0 : i32
    %c0_i32_1 = arith.constant 0 : i32
    return %arg2, %c0_i32, %c0_i32_0 : i32, i32, i32
  }
  func.func @transform_2(%arg0: i32, %arg1: i32, %arg2: i32, %arg3: memref<1xi32, #tpu.memory_space<smem>>, %arg4: memref<3xf32, #tpu.memory_space<smem>>, %arg5: memref<3xf32, #tpu.memory_space<smem>>) -> (i32, i32) {
    %c0_i32 = arith.constant 0 : i32
    %c0_i32_0 = arith.constant 0 : i32
    %c0_i32_1 = arith.constant 0 : i32
    return %c0_i32, %c0_i32_0 : i32, i32
  }
  func.func @transform_3(%arg0: i32, %arg1: i32, %arg2: i32, %arg3: memref<1xi32, #tpu.memory_space<smem>>, %arg4: memref<3xf32, #tpu.memory_space<smem>>, %arg5: memref<3xf32, #tpu.memory_space<smem>>) -> (i32, i32, i32, i32) {
    %c0_i32 = arith.constant 0 : i32
    %c0_i32_0 = arith.constant 0 : i32
    return %arg0, %arg1, %arg2, %c0_i32 : i32, i32, i32, i32
  }
}

</mosaic_0001>

<bundles_post_ra>
// kernel: tpu_custom_call.1
= control target key start
LH: loop header
LB: loop body
LE: loop exit
PB: predicated region body
PF: predicated region fallthrough
CT: control target
= control target key end

     0   :  { %s1060_s0 = inlined_call_operand.<no memory space> [shape: s32[1], index: 0, kind: input, shape index: {}]   ;;  %s1061_s1 = inlined_call_operand.vmem [shape: f32[3], index: 1, kind: input, shape index: {}]   ;;  %s1062_s3 = inlined_call_operand.hbm [shape: u8[2,3,16,16], index: 3, kind: input, shape index: {}]   ;;  %s1063_s4 = inlined_call_operand.hbm [shape: bf16[1,8,16], index: 4, kind: input, shape index: {}]   ;;  %s1064_s5 = inlined_call_operand.vmem [shape: bf16[16,128], index: 5, kind: input, shape index: {}]   ;;  %s1065_s6 = inlined_call_operand.hbm [shape: f32[2,3,8,128], index: 6, kind: output, shape index: {}]   ;;  %s1066_s2 = inlined_call_operand.hbm [shape: f32[3], index: 2, kind: input, shape index: {}]  }
   0x1   :  { %1077 = sst [smem:[#allocation22_spill]] %s1063_s4  ;;  %s12_s25 = sshll.u32 %s1061_s1, 4  ;;  %s13_s25 = int_to_ptr.vmem [resolvable:$true] %s12_s25 }
   0x2   :  { %1078 = sst [smem:[#allocation23_spill]] %s1065_s6  ;;  %s634_s26 = scalar_lea.vmem %s13_s25, 16 }
   0x3   :  { %11 = sst [smem:[#allocation4]] %s1060_s0  ;;  %p635_p0 = scmp.ne.s32.totalorder %s13_s25, %s634_s26 }
   0x4   :  { %p639_p1 = scmp.lt.s32.totalorder %s13_s25, %s13_s25  ;;  %p640_p2 = scmp.lt.s32.totalorder %s634_s26, %s634_s26 }
   0x6   :  { %p641_p3 = por %p640_p2, %p639_p1 }
   0x8   :  { %p642_p4 = pnand %p641_p3, %p635_p0 }
   0xa   :  { %645 = shalt.err (!%p642_p4)  }
   0xb   :  { %s812_s27 = smov [#allocation5]   ;;  %s813_s28 = smov [#allocation6]  }
   0xc   :  { %15 = dma.vmem_to_smem %s13_s25, 16, %s812_s27, [#allocation3] }
   0xd   :  { %17 = dma.hbm_to_smem %s1066_s2, 16, %s813_s28, [#allocation3] }
   0xe   :  { %766 = dma.done.wait [#allocation3], 32 }
   0xf   :  { %767 = vsyncadd [#allocation3], 4294967264 }
  0x10   :  { %19 = sfence }
  0x11   :  { %20 = vsyncpa [#allocation8], 0 }
  0x12   :  { %22 = vsyncpa [#allocation8 + $0x1], 0 }
  0x13   :  { %23 = vsyncpa [#allocation11], 0 }
  0x14   :  { %24 = vsyncpa [#allocation9], 0 }
  0x15   :  { %26 = vsyncpa [#allocation9 + $0x1], 0  ;;  %s865_s0 = smov 0   ;;  %s867_s1 = smov 0  }
  0x16   :  { %s869_s7 = smov 0   ;;  %s871_s8 = smov 0  }
  0x17   :  { %s873_s9 = smov 0   ;;  %s875_s10 = smov 0  }
  0x18   :  { %s877_s2 = smov 0   ;;  %s879_s11 = smov 0  }
  0x19 LB: > { %1079 = sst [smem:[#allocation17_spill]] %s782_s0  ;;  %s498_s12 = sadd.s32 4294967295, %s810_s11   ;;  %s810_s11 = sphi %s879_s11, %s32_s11   ;;  %s806_s2 = sphi %s877_s2, %s1108_s2   ;;  %s802_s10 = sphi %s875_s10, %s1107_s10   ;;  %s798_s9 = sphi %s873_s9, %s1106_s9   ;;  %s794_s8 = sphi %s871_s8, %s1101_s8   ;;  %s790_s7 = sphi %s869_s7, %s1105_s7   ;;  %s786_s1 = sphi %s867_s1, %s1104_s1   ;;  %s782_s0 = sphi %s865_s0, %s1103_s0  }
  0x1a   : > { %1080 = sst [smem:[#allocation18_spill]] %s802_s10  ;;  %s499_s13 = sadd.s32 4294967294, %s810_s11  }
  0x1b   : > { %1081 = sst [smem:[#allocation19_spill]] %s810_s11  ;;  %p67_p5 = scmp.ne.s32.totalorder %s790_s7, %s786_s1 }
  0x1c   : > { %p68_p6 = scmp.eq.s32.totalorder %s810_s11, 0  ;;  %p73_p7 = scmp.ne.s32.totalorder %s786_s1, %s782_s0 }
  0x1d   : > { %p913_p8 = scmp.eq.s32.totalorder %s498_s12, 0  ;;  %p148_p9 = scmp.eq.s32.totalorder %s498_s12, 5 }
  0x1e   : > { %p917_p10 = por %p68_p6, %p67_p5  ;;  %p154_p11 = scmp.eq.s32.totalorder %s499_s13, 5 }
  0x1f   : > { %p923_p12 = por %p913_p8, %p73_p7  ;;  %p927_p13 = por %p148_p9, %p67_p5 }
  0x20   : > { %p931_p0 = por %p154_p11, %p73_p7  ;;  %p500_p1 = scmp.ge.s32.totalorder %s810_s11, 1 }
  0x21   : > { %s1084_s17 = scalar_select %p923_p12, 1, 0 }
  0x22   : > { %s1085_s18 = scalar_select %p927_p13, 1, 0 }
  0x23   : > { %s1086_s19 = scalar_select %p931_p0, 1, 0 }
  0x24   : > { %p161_p2 = scmp.lt.s32.totalorder %s810_s11, 7  ;;  %s814_s21 = smov [#allocation10]  }
  0x25   : > { %1087 = sst [smem:[#allocation20_spill]] %s1086_s19  ;;  %s176_s22 = sshll.u32 %s814_s21, 4  ;;  %s177_s22 = int_to_ptr.vmem [resolvable:$true] %s176_s22 }
  0x26   : > { %p937_p3 = pnand %p500_p1, %p161_p2  ;;  %p558_p4 = scmp.lt.s32.totalorder %s810_s11, 6 }
  0x27   : > { %s47_s24 = sadd.s32 1, %s802_s10  ;;  %s665_s25 = scalar_lea.vmem %s177_s22, 64 }
  0x28   : > { %s1088_s20 = scalar_select %p937_p3, 1, 0 }
  0x29   : > { %p545_p5 = pneg %p937_p3  ;;  %p946_p6 = pnand %p558_p4, %p917_p10 }
  0x2a   : > { %p666_p11 = scmp.ne.s32.totalorder %s177_s22, %s665_s25  ;;  %p673_p0 = scmp.lt.s32.totalorder %s177_s22, %s177_s22 }
  0x2b   : > { %p546_p7 = pnand %p545_p5, %p913_p8  ;;  %p674_p13 = scmp.lt.s32.totalorder %s665_s25, %s665_s25 }
  0x2d   : > { %p656_p9 = pneg %p546_p7  ;;  %p675_p12 = por %p674_p13, %p673_p0 }
  0x2f   : > { %p668_p1 = pnand %p666_p11, %p656_p9 }
  0x31   : > { %p669_p2 = pneg %p668_p1 }
  0x33   : > { %p676_p3 = pnand %p675_p12, %p669_p2 }
  0x35   : > { %679 = shalt.err (!%p676_p3)
}
  0x36   : > { %s1090_s4 = sld [smem:[#allocation22_spill]]  ;;  %p49_p10 = scmp.ge.s32.totalorder %s47_s24, 3 }
  0x37   : > { %s51_s28 = sadd.s32 1, %s806_s2  ;;  %s190_s29 = sand.u32 1, %s790_s7  }
  0x38   : > { %s504_s30 = sshll.u32 %s802_s10, 1  ;;  %s1110_s24 = smov (%p49_p10, %s47_s24), 0 }
  0x39   : > { %1091 = sst [smem:[#allocation21_spill]] %s1110_s24  ;;  %s1112_s28 = smov (!%p49_p10, %s51_s28), %s806_s2 }
  0x3a   : > { %s56_s12 = ssub.s32 %s802_s10, %s1110_s24  ;;  %p53_p12 = scmp.ge.s32.totalorder %s1112_s28, 2 }
  0x3b   : > { %s503_s13 = sshll.u32 %s190_s29, 2  ;;  %s535_s16 = smul.u32 6, %s806_s2 }
  0x3c   : > { %548 = dma.hbm_to_vmem [thread:$0]  (!%p546_p7), %s1090_s4, 64, %s177_s22, [#allocation11]  }
  0x3d   : > { %s1114_s28 = smov (%p53_p12, %s1112_s28), 0  ;;  %s200_s21 = sadd.s32 %s535_s16, %s504_s30 }
  0x3e   : > { %s194_s22 = scalar_lea.vmem [#allocation7], %s503_s13  ;;  %s55_s26 = ssub.s32 %s806_s2, %s1114_s28 }
  0x3f   : > { %s203_s25 = sshll.u32 %s194_s22, 4  ;;  %s505_s27 = sshll.u32 %s200_s21, 5  ;;  %s204_s25 = int_to_ptr.vmem [resolvable:$true] %s203_s25 }
  0x40   : > { %s57_s14 = sor.u32 %s56_s12, %s55_s26  ;;  %s202_s0 = scalar_lea.hbm %s1062_s3, %s505_s27 }
  0x41   : > { %p58_p13 = scmp.eq.s32.totalorder %s57_s14, 0  ;;  %s1092_s24 = sadd.s32 1, %s790_s7 }
  0x42   : > { %s191_s11 = scalar_lea.sflag [#allocation8], %s190_s29  ;;  %p682_p0 = pneg %p946_p6 }
  0x43   : > { %s975_s10 = scalar_select %p58_p13, %s790_s7, %s1092_s24  }
  0x44   : > { %s693_s6 = scalar_lea.vmem %s204_s25, 64  ;;  %s815_s30 = smov [#allocation7]  }
  0x45   : > { %p694_p3 = scmp.ne.s32.totalorder %s204_s25, %s693_s6  ;;  %s698_s13 = sshll.u32 %s815_s30, 4  ;;  %s699_s13 = int_to_ptr.vmem [resolvable:$false] %s698_s13 }
  0x46   : > { %s700_s12 = scalar_lea.vmem %s699_s13, 128  ;;  %p701_p7 = scmp.lt.s32.totalorder %s204_s25, %s699_s13 }
  0x47   : > { %p696_p4 = pnand %p694_p3, %p682_p0  ;;  %p702_p9 = scmp.lt.s32.totalorder %s700_s12, %s693_s6 }
  0x49   : > { %p697_p5 = pneg %p696_p4  ;;  %p703_p11 = por %p702_p9, %p701_p7 }
  0x4b   : > { %p704_p1 = pnand %p703_p11, %p697_p5 }
  0x4d   : > { %707 = shalt.err (!%p704_p1)
}
  0x4e   : > { %s816_s4 = smov 32   ;;  %s817_s14 = smov 2  }
  0x4f   : > { %552 = dma.hbm_to_vmem [thread:$0]  (!%p946_p6), %s202_s0, 64, %s204_s25, %s191_s11, %s816_s4, %s816_s4, %s817_s14  }
  0x50   : > { %p1093_p2 = scmp.ne.s32.totalorder %s1088_s20, 0 }
  0x51   : > { %s984_s19 = sand.u32 (!%p1093_p2), 1, %s786_s1   ;;  %p1094_p10 = scmp.ne.s32.totalorder (!%p1093_p2), %s1084_s17, 0 }
  0x52   : > { %215 = sbr.rel (%p1093_p2) target bundleno = 511 (0x1ff), region = 32  ;;  %s507_s24 = sshll.u32 (!%p1093_p2), %s984_s19, 2 }
  0x53   : > { %s218_s29 = scalar_lea.sflag (!%p1093_p2), [#allocation8], %s984_s19  ;;  %s221_s6 = scalar_lea.vmem (!%p1093_p2), [#allocation7], %s507_s24 }
  0x57   : > { %769 = dma.done.wait (%p1094_p10), %s218_s29, 64  }
  0x58   : > { %771 = vsyncadd (%p1094_p10), %s218_s29, 4294967232 }
  0x59   : > { %773 = dma.done.wait (%p913_p8), [#allocation11], 64  }
  0x5a   : > { %775 = vsyncadd (%p913_p8), [#allocation11], 4294967232  ;;  %v818_v0 = vmov 0.0   ;;  %s260_s0 = sld [smem:[#allocation4]]  ;;  %vm819_vm0 = vmmov 0   ;;  %vm257_vm1 = vcmask 125952  }
  0x5b   : > { %523 = vmatprep.subr.bf16.mxu0 %v818_v0  ;;  %525 = vmatprep.mubr.msk.bf16.mxu0 %vm819_vm0, %v818_v0  ;;  %v253_v1 = vld [vmem:[%s221_s6] sm:$0x3]  ;;  %v254_v2 = vld [vmem:[%s221_s6 + $0x2] sm:$0x3]  ;;  %v267_v6 = vld [vmem:[#allocation10] sm:$0xf] }
  0x5c   : > { %529 = vmatprep.subr.bf16.mxu1 %v818_v0  ;;  %531 = vmatprep.mubr.msk.bf16.mxu1 %vm819_vm0, %v818_v0  ;;  %v255_v3 = vunpack.c.l.u8.bf16 %v253_v1  ;;  %v256_v4 = vunpack.c.l.u8.bf16 %v254_v2  ;;  %vm274_vm2 = vcmask 130048   ;;  %v633_v7 = vld [vmem:[%s1064_s5] sm:$0xff]   ;;  %s370_s16 = sld [smem:[#allocation5 + %s794_s8]]  ;;  %s536_s22 = smul.u32 3, %s798_s9 }
  0x5d   : > { %530 = vmatpush3.bf16.msra.mxu1 %v633_v7  ;;  %s373_s21 = sld [smem:[#allocation6 + %s794_s8]]  ;;  %s509_s25 = sshll.u32 %s984_s19, 3 }
  0x5e   : > { %258 = vst.msk [vmem:[#allocation2] sm:$0xf] %vm257_vm1, %v255_v3  ;;  %259 = vst.msk [vmem:[#allocation2 + $0x4] sm:$0xf] %vm257_vm1, %v256_v4  ;;  %s390_s26 = sadd.s32 %s794_s8, %s536_s22  ;;  %s247_s30 = scalar_lea.vmem [#allocation12], %s509_s25 }
  0x5f   : > { %s516_s27 = sshll.u32 %s390_s26, 7  ;;  %s394_s13 = sshll.u32 %s247_s30, 4  ;;  %s1009_s13 = int_to_ptr.vmem [resolvable:$true] %s394_s13 }
  0x60   : > { %s261_s11 = sshra.s32 %s260_s0, 3  ;;  %s1095_s14 = sld [smem:[#allocation23_spill]] }
  0x61   : > { %s510_s17 = sshll.u32 %s261_s11, 2  ;;  %s378_s8 = scalar_lea.sflag [#allocation9], %s984_s19 }
  0x62   : > { %s264_s15 = scalar_lea.vmem [#allocation2], %s510_s17  ;;  %v371_v13 = vstv %s370_s16  ;;  %s708_s9 = scalar_lea.vmem %s1009_s13, 128 }
  0x63   : > { %v374_v15 = vstv %s373_s21  ;;  %p709_p8 = scmp.ne.s32.totalorder %s1009_s13, %s708_s9  ;;  %p1096_p6 = scmp.ne.s32.totalorder %s1085_s18, 0 }
  0x64   : > { %s820_s29 = smov [#allocation12]  }
  0x65   : > { %v632_v5 = vld [vmem:[%s264_s15] sm:$0xff]   ;;  %p710_p12 = pnand %p709_p8, %p1096_p6  ;;  %s712_s6 = sshll.u32 %s820_s29, 4  ;;  %s713_s6 = int_to_ptr.vmem [resolvable:$false] %s712_s6 }
  0x66   : > { %524 = vmatpush3.bf16.msra.mxu0 %v632_v5  ;;  %s1007_s24 = scalar_lea.hbm %s1095_s14, %s516_s27  ;;  %s714_s0 = scalar_lea.vmem %s713_s6, 256 }
  0x67   : > { %p711_p13 = pneg %p710_p12  ;;  %p715_p0 = scmp.lt.s32.totalorder %s1009_s13, %s713_s6 }
  0x68   : > { %p716_p3 = scmp.lt.s32.totalorder %s714_s0, %s708_s9 }
  0x69   : > { %526 = vmatmul.mubr.msk.bf16.vlgmr.msra.gmra.mxu0 %vm274_vm2, %v267_v6 }
  0x6a   : > { %p717_p4 = por %p716_p3, %p715_p0 }
  0x6c   : > { %p718_p5 = pnand %p717_p4, %p711_p13 }
 0x129   : > { %v312_v8 = vpop.f32.mrf.mxu0 }
 0x12a   : > { %v318_v9 = vpack.c.bf16 %v312_v8, %v312_v8 }
 0x12b   : > { %v527_v10 = vpop.f32.mrf.mxu0 }
 0x12c   : > { %532 = vmatmul.mubr.msk.bf16.vlgmr.msra.gmra.mxu1 %vm274_vm2, %v318_v9 }
 0x12d   : > { %v315_v11 = vpop.f32.mrf.mxu0 }
 0x12f   : > { %v528_v12 = vpop.f32.mrf.mxu0 }
 0x1ec   : > { %v364_v14 = vpop.f32.mrf.mxu1 }
 0x1ed   : > { %v372_v16 = vmul.f32 %v371_v13, %v364_v14 }
 0x1ee   : > { %v533_v17 = vpop.f32.mrf.mxu1 }
 0x1ef   : > { %v375_v18 = vadd.f32 %v374_v15, %v372_v16 }
 0x1f0   : > { %v367_v19 = vpop.f32.mrf.mxu1 }
 0x1f1   : > { %376 = vst [vmem:[%s247_s30] sm:$0xff] %v375_v18 }
 0x1f2   : > { %v534_v20 = vpop.f32.mrf.mxu1 }
 0x1f3   : > { %721 = shalt.err (!%p718_p5)
}
 0x1f4   : > { %s722_s11 = scalar_lea.hbm %s1007_s24, 128  ;;  %s726_s15 = scalar_lea.hbm %s1095_s14, 768 }
 0x1f5   : > { %p723_p7 = scmp.ne.s32.totalorder %s1007_s24, %s722_s11  ;;  %p727_p1 = scmp.lt.s32.totalorder %s1007_s24, %s1095_s14 }
 0x1f6   : > { %p728_p2 = scmp.lt.s32.totalorder %s726_s15, %s722_s11 }
 0x1f7   : > { %p724_p9 = pnand %p723_p7, %p1096_p6 }
 0x1f8   : > { %p729_p10 = por %p728_p2, %p727_p1 }
 0x1f9   : > { %p725_p11 = pneg %p724_p9 }
 0x1fb   : > { %p730_p8 = pnand %p729_p10, %p725_p11 }
 0x1fd   : > { %733 = shalt.err (!%p730_p8)
}
 0x1fe   : > { %543 = dma.vmem_to_hbm [thread:$0]  (%p1096_p6), %s1009_s13, 128, %s1007_s24, %s378_s8  }
 0x1ff PF: > { %s1097_s16 = sld [smem:[#allocation19_spill]] }
 0x200   : > { %s1098_s21 = sld [smem:[#allocation17_spill]] }
 0x201   : > { %s1099_s22 = sld [smem:[#allocation20_spill]] }
 0x205   : > { %p560_p12 = scmp.ge.s32.totalorder %s1097_s16, 2 }
 0x206   : > { %s406_s25 = sand.u32 1, %s1098_s21  }
 0x207   : > { %p1100_p13 = scmp.ne.s32.totalorder %s1099_s22, 0  ;;  %s407_s26 = scalar_lea.sflag [#allocation9], %s406_s25 }
 0x209   : > { %p554_p0 = pnand %p560_p12, %p1100_p13 }
 0x20b   : > { %p555_p3 = pneg %p554_p0 }
 0x20d   : > { %777 = dma.done.wait (%p555_p3), %s407_s26, 128  }
 0x20e   : > { %779 = vsyncadd (%p555_p3), %s407_s26, 4294967168  ;;  %s32_s11 = sadd.s32 1, %s1097_s16   ;;  %s1101_s8 = sld [smem:[#allocation18_spill]] }
 0x20f   : > { %p29_p4 = scmp.ge.s32.totalorder %s32_s11, 8   ;;  %s1102_s18 = sld [smem:[#allocation21_spill]] }
 0x210   : > { %s1103_s0 = smov %s786_s1  ;;  %s1104_s1 = smov %s790_s7 }
 0x211   : > { %s1105_s7 = smov %s975_s10  ;;  %s1106_s9 = smov %s806_s2 }
 0x212   : > { %s1108_s2 = smov %s1114_s28  ;;  %31 = sbr.rel (!%p29_p4) target bundleno = 25 (0x19), region = 87 }
 0x215   : > { %s1107_s10 = smov %s1102_s18 }
 0x217   :  { %412 = vsyncpa [#allocation8], 1 }
 0x218   :  { %414 = vsyncpa [#allocation8 + $0x1], 1 }
 0x219   :  { %415 = vsyncpa [#allocation11], 1 }
 0x21a   :  { %416 = vsyncpa [#allocation9], 1 }
 0x21b   :  { %418 = vsyncpa [#allocation9 + $0x1], 1 }

</bundles_post_ra>
